<compile_context>
chip_gen: v7x
topology: tpu7x:2x2x1
jax: 0.10.0
libtpu: 0.0.40
codegen_flags: <defaults>
</compile_context>

<pallas_src>
import jax
import jax.numpy as jnp
from jax.experimental import pallas as pl
from jax.experimental.pallas import tpu as pltpu


def _invconv_kernel(w_ref, x_ref, o_ref):
    # w_ref: (C_out, C_in) precomputed weight (grid-invariant, built in the wrapper)
    # x_ref / o_ref: (Bb, C, tile_n) lane-dense blocks of the NCHW tensor viewed as (B, C, H*W)
    w = w_ref[...]
    for b in range(x_ref.shape[0]):          # Bb is small & static -> unrolled
        o_ref[b] = jnp.dot(
            w, x_ref[b], preferred_element_type=jnp.float32
        ).astype(o_ref.dtype)


def calc_weight(params):
    """LU recomposition, identical to PyTorch InvConv2dLU.calc_weight (tiny C x C op)."""
    lower = params["w_l"] * params["l_mask"] + params["l_eye"]
    diag = params["s_sign"] * jnp.exp(params["w_s"]) + 1e-5   # matches the given module
    upper = params["w_u"] * params["u_mask"] + jnp.diag(diag)
    return (params["w_p"] @ lower @ upper).astype(jnp.float32)   # (C_out, C_in)


def _select_schedule(B, C, N, itemsize):
    """Pick (Bb, tile_n, grid, vmem_limit) from static shapes + chip generation."""
    try:
        vmem_cap = pltpu.get_tpu_info().vmem_capacity_bytes
    except Exception:
        vmem_cap = 128 * 2**20
    if vmem_cap <= 64 * 2**20:              # v7x-class: 64 MiB VMEM per TensorCore
        target_bytes = 4 * 2**20
        gen_cap = 32 * 2**20
    else:                                   # v5e / v6e: 128 MiB VMEM
        target_bytes = 12 * 2**20
        gen_cap = 64 * 2**20

    # Lane-dense spatial tile: multiple of 128, or the full extent when N < 128.
    if N <= 128:
        tile_n = N
    else:
        max_tile = (N // 128) * 128
        want = max(128, (target_bytes // (itemsize * C)) // 128 * 128)
        tile_n = max(128, min(want, max_tile))

    # Widen over batch when one image's tile is small (deep squeezed Glow levels).
    per_image_bytes = C * tile_n * itemsize
    Bb = max(1, min(B, target_bytes // max(1, per_image_bytes)))

    grid_b = pl.cdiv(B, Bb)
    grid_n = pl.cdiv(N, tile_n)
    # v7x megacore: keep at least 2 grid steps so both TensorCores get work.
    while grid_b * grid_n < 2:
        if Bb > 1:
            Bb = (Bb + 1) // 2
        elif tile_n > 128:
            tile_n = max(128, ((tile_n // 2 + 127) // 128) * 128)
        else:
            break
        grid_b = pl.cdiv(B, Bb)
        grid_n = pl.cdiv(N, tile_n)

    # 2 double-buffered streamed blocks (x + out) + weight + headroom.
    block_bytes = Bb * C * tile_n * itemsize
    needed = 4 * block_bytes + 2 * C * C * itemsize + 4 * 2**20
    vmem_limit = int(min(gen_cap, max(32 * 2**20, needed)))
    return Bb, tile_n, grid_b, grid_n, vmem_limit


@jax.jit
def invconv2d_lu_forward(x_nchw, params):
    B, C, H, W = x_nchw.shape
    N = H * W

    # Weight reconstructed ONCE outside the kernel, cast to the activation dtype
    # (MXU-native bf16 inputs when the model runs in bf16).
    weight = calc_weight(params).astype(x_nchw.dtype)

    # Consume NCHW directly: (B, C, H, W) -> (B, C, H*W) is a free contiguous reshape.
    x = x_nchw.reshape(B, C, N)

    Bb, tile_n, grid_b, grid_n, vmem_limit = _select_schedule(
        B, C, N, x_nchw.dtype.itemsize
    )

    out = pl.pallas_call(
        _invconv_kernel,
        out_shape=jax.ShapeDtypeStruct((B, C, N), x_nchw.dtype),
        grid_spec=pltpu.PrefetchScalarGridSpec(
            num_scalar_prefetch=0,
            grid=(grid_b, grid_n),
            in_specs=[
                pl.BlockSpec((C, C), lambda b, n: (0, 0)),               # weight (constant)
                pl.BlockSpec((Bb, C, tile_n), lambda b, n: (b, 0, n)),   # x tile
            ],
            out_specs=pl.BlockSpec((Bb, C, tile_n), lambda b, n: (b, 0, n)),
        ),
        compiler_params=pltpu.CompilerParams(
            dimension_semantics=("parallel", "parallel"),
            vmem_limit_bytes=vmem_limit,
        ),
    )(weight, x)

    return out.reshape(B, C, H, W)


def _np_like_lu_params(key, channels):
    """Deterministic parameter init mirroring the PyTorch __init__ (QR then LU)."""
    w = jax.random.normal(key, (channels, channels), dtype=jnp.float32)
    q, _ = jnp.linalg.qr(w)
    q = q.astype(jnp.float32)
    w_p, w_l, w_u = jax.scipy.linalg.lu(q)        # q = P @ L @ U
    w_s = jnp.diag(w_u)
    w_u = jnp.triu(w_u, 1)
    u_mask = jnp.triu(jnp.ones_like(w_u), 1)
    l_mask = u_mask.T
    s_sign = jnp.sign(w_s)
    l_eye = jnp.eye(channels, dtype=jnp.float32)
    return dict(
        w_p=w_p.astype(jnp.float32),
        w_l=w_l.astype(jnp.float32),
        w_s=jnp.log(jnp.abs(w_s)).astype(jnp.float32),   # trainable log|s|
        w_u=w_u.astype(jnp.float32),
        s_sign=s_sign.astype(jnp.float32),
        l_mask=l_mask.astype(jnp.float32),
        u_mask=u_mask.astype(jnp.float32),
        l_eye=l_eye,
    )


def _reference_forward(x_nchw, params):
    weight = calc_weight(params)                  # (C_out, C_in)
    # 1x1 conv in NCHW
    return jnp.einsum("bchw,oc->bohw", x_nchw.astype(jnp.float32), weight,
                      precision=jax.lax.Precision.HIGHEST)


# TODO(synk): reverse() (inverse-weight conv) is not implemented; only the forward pass.

if __name__ == "__main__":
    key = jax.random.PRNGKey(0)
    k_param, k_x = jax.random.split(key)

    B, C = 2, 4
    params = _np_like_lu_params(k_param, C)

    # Main check (f32, lane-aligned spatial extent).
    x = jax.random.normal(k_x, (B, C, 16, 16), dtype=jnp.float32)
    out = jax.block_until_ready(invconv2d_lu_forward(x, params))
    ref = _reference_forward(x, params)
    assert out.shape == (B, C, 16, 16)
    assert jnp.allclose(out, ref, atol=1e-4, rtol=1e-4), "mismatch vs reference (f32)"

    # Ragged spatial extent (H*W not a multiple of 128) -> exercises masked tail block.
    x_r = jax.random.normal(jax.random.PRNGKey(1), (B, C, 16, 9), dtype=jnp.float32)
    out_r = jax.block_until_ready(invconv2d_lu_forward(x_r, params))
    ref_r = _reference_forward(x_r, params)
    assert jnp.allclose(out_r, ref_r, atol=1e-4, rtol=1e-4), "mismatch vs reference (ragged)"

    # Small spatial extent (H*W < 128) in bf16 -> exercises batch-widened blocks + bf16 I/O.
    x_b = jax.random.normal(jax.random.PRNGKey(2), (B, C, 8, 8), dtype=jnp.bfloat16)
    out_b = jax.block_until_ready(invconv2d_lu_forward(x_b, params))
    ref_b = _reference_forward(x_b, params)
    assert out_b.dtype == jnp.bfloat16
    assert jnp.allclose(out_b.astype(jnp.float32), ref_b, atol=5e-2, rtol=5e-2), \
        "mismatch vs reference (bf16)"

    print("KERNEL_OK")
</pallas_src>

<mosaic_0001>
module attributes {stable_mosaic.version = 11 : i64} {
  func.func @_invconv_kernel(%arg0: i32, %arg1: i32, %arg2: memref<4x4xf32, #tpu.memory_space<vmem>>, %arg3: memref<1x4x256xf32, #tpu.memory_space<vmem>>, %arg4: memref<1x4x256xf32, #tpu.memory_space<vmem>>) attributes {dimension_semantics = [#tpu.dimension_semantics<parallel>, #tpu.dimension_semantics<parallel>], iteration_bounds = array<i64: 2, 1>, scalar_prefetch = 0 : i64, scratch_operands = 0 : i64, tpu.core_type = #tpu.core_type<tc>, window_params = [{pipeline_mode = #tpu.pipeline_mode<synchronous>, transform_indices = @transform_0, window_bounds = array<i64: 4, 4>}, {transform_indices = @transform_1, window_bounds = array<i64: 1, 4, 256>}, {transform_indices = @transform_2, window_bounds = array<i64: 1, 4, 256>}]} {
    %c0 = arith.constant 0 : index
    %c0_0 = arith.constant 0 : index
    %0 = vector.load %arg2[%c0, %c0_0] : memref<4x4xf32, #tpu.memory_space<vmem>>, vector<4x4xf32>
    %c0_1 = arith.constant 0 : index
    %c0_2 = arith.constant 0 : index
    %c0_3 = arith.constant 0 : index
    %1 = vector.load %arg3[%c0_1, %c0_2, %c0_3] : memref<1x4x256xf32, #tpu.memory_space<vmem>>, vector<1x4x256xf32>
    %2 = vector.shape_cast %1 : vector<1x4x256xf32> to vector<4x256xf32>
    %cst = arith.constant dense<0.000000e+00> : vector<4x256xf32>
    %3 = tpu.matmul %0, %2, %cst {dimension_numbers = #tpu.dot_dimension_numbers<[1], [0], [0], [1], [0, 0, 1, 1], [], []>} : vector<4x4xf32>, vector<4x256xf32>, vector<4x256xf32> -> vector<4x256xf32>
    %c0_4 = arith.constant 0 : index
    %c0_5 = arith.constant 0 : index
    %c0_6 = arith.constant 0 : index
    %4 = vector.load %arg4[%c0_4, %c0_5, %c0_6] : memref<1x4x256xf32, #tpu.memory_space<vmem>>, vector<1x4x256xf32>
    %5 = vector.shape_cast %4 : vector<1x4x256xf32> to vector<4x256xf32>
    %6 = vector.shape_cast %3 : vector<4x256xf32> to vector<1x4x256xf32>
    tpu.vector_store %arg4[%c0_4, %c0_5, %c0_6], %6 {strides = array<i32>} : memref<1x4x256xf32, #tpu.memory_space<vmem>>, vector<1x4x256xf32>,
    return
  }
  func.func @transform_0(%arg0: i32, %arg1: i32) -> (i32, i32) {
    %c0_i32 = arith.constant 0 : i32
    %c0_i32_0 = arith.constant 0 : i32
    %c0_i32_1 = arith.constant 0 : i32
    return %c0_i32, %c0_i32_0 : i32, i32
  }
  func.func @transform_1(%arg0: i32, %arg1: i32) -> (i32, i32, i32) {
    %c0_i32 = arith.constant 0 : i32
    %c0_i32_0 = arith.constant 0 : i32
    return %arg0, %c0_i32, %arg1 : i32, i32, i32
  }
  func.func @transform_2(%arg0: i32, %arg1: i32) -> (i32, i32, i32) {
    %c0_i32 = arith.constant 0 : i32
    %c0_i32_0 = arith.constant 0 : i32
    return %arg0, %c0_i32, %arg1 : i32, i32, i32
  }
}

</mosaic_0001>

<bundles_post_ra>
// kernel: invconv2d_lu_forward.1
= control target key start
LH: loop header
LB: loop body
LE: loop exit
PB: predicated region body
PF: predicated region fallthrough
CT: control target
= control target key end

     0   :  { %s441_s9 = smov 0   ;;  %s443_s10 = smov 0   ;;  %s474_s0 = inlined_call_operand.vmem [shape: f32[4,4], index: 0, kind: input, shape index: {}]   ;;  %s475_s1 = inlined_call_operand.vmem [shape: f32[2,4,256], index: 1, kind: input, shape index: {}]   ;;  %s476_s2 = inlined_call_operand.vmem [shape: f32[2,4,256], index: 2, kind: output, shape index: {}]  }
   0x1   :  { %s445_s11 = smov 0  }
   0x2 LB: > { %s24_s12 = sadd.s32 1, %s419_s10  ;;  %p363_p0 = scmp.ge.s32.totalorder %s423_s11, 1  ;;  %s423_s11 = sphi %s445_s11, %s12_s11   ;;  %s419_s10 = sphi %s443_s10, %s478_s10   ;;  %s415_s9 = sphi %s441_s9, %s477_s9  }
   0x3   : > { %p26_p1 = scmp.ge.s32.totalorder %s24_s12, 2  ;;  %p133_p2 = scmp.lt.s32.totalorder %s423_s11, 3 }
   0x5   : > { %s480_s12 = smov (%p26_p1, %s24_s12), 0  ;;  %p134_p3 = pnand %p363_p0, %p133_p2 }
   0x6   : > { %p164_p4 = scmp.lt.s32.totalorder (!%p134_p3), %s415_s9, 1  ;;  %v425_v0 = vmov (!%p134_p3), 0.0   ;;  %vm191_vm0 = vcmask (!%p134_p3), 1043456   ;;  %v183_v3 = vld [vmem:[%s474_s0] sm:$0xf] (!%p134_p3)  ;;  %vm187_vm1 = vcmask (!%p134_p3), 31744  }
   0x7   : > { %137 = sbr.rel (%p134_p3) target bundleno = 238 (0xee), region = 28  ;;  %260 = vmatprep.mubr.f32.mxu0 (!%p134_p3), %v425_v0 }
   0xe   : > { %s482_s9 = smov (!%p164_p4, %s415_s9), 1 }
   0xf   : > { %s373_s13 = sshll.u32 %s482_s9, 3 }
  0x10   : > { %s171_s16 = scalar_lea.vmem %s475_s1, %s373_s13  ;;  %s181_s21 = scalar_lea.vmem %s476_s2, %s373_s13 }
  0x11   : > { %v184_v1 = vld [vmem:[%s171_s16] sm:$0xff] }
  0x12   : > { %v186_v2 = vcombine.high %v184_v1, %v184_v1 }
  0x14   : > { %368 = vmatprep.subr.msk.mxu0 %vm191_vm0, %v186_v2 }
  0x15   : > { %369 = vmatpush1.msk.msra.mxu0 %vm191_vm0, %v184_v1 }
  0x16   : > { %370 = vmatmul.mubr.msk.f32.vlgmr.msra.gmra.mrb[0].mxu0 %vm187_vm1, %v183_v3 }
  0xe9   : > { %v262_v4 = vpop.f32.mrb[0].mxu0 }
  0xea   : > { %v264_v5 = vpop.f32.mrb[1].mxu0 }
  0xeb   : > { %v269_v6 = vcombine.low %v262_v4, %v264_v5 }
  0xed   : > { %271 = vst [vmem:[%s181_s21] sm:$0xff] %v269_v6 }
  0xee PF: > { %s12_s11 = sadd.s32 1, %s423_s11   ;;  %s477_s9 = smov %s419_s10 }
  0xef   : > { %p9_p5 = scmp.ge.s32.totalorder %s12_s11, 4   ;;  %s478_s10 = smov %s480_s12 }
  0xf1   :  { %11 = sbr.rel (!%p9_p5) target bundleno = 2 (0x2), region = 58 }

</bundles_post_ra>
